<compile_context>
chip_gen: v5e
topology: v5e:2x2
jax: 0.10.0
libtpu: 0.0.40
codegen_flags: <defaults>
</compile_context>

<pallas_src>
import functools

import jax
import jax.numpy as jnp
from jax import lax
from jax.experimental import pallas as pl
from jax.experimental.pallas import tpu as pltpu


def bn_train_kernel(x_ref, gamma_ref, beta_ref, out_ref, mean_ref, var_ref, *, eps):
    """Training-mode BN over one channel block.

    x_ref/out_ref: (N, CB, HW); gamma/beta/mean/var refs: (CB, 1).
    Computes biased per-channel mean/var (like torch .mean()), then applies a
    folded scale/shift so the per-element math is one multiply + one add.
    """
    x = x_ref[...].astype(jnp.float32)                     # (N, CB, HW)
    n, cb, hw = x.shape
    inv_l = 1.0 / (n * hw)

    # Per-channel mean / biased variance, accumulated in f32.
    sum_c = jnp.sum(jnp.sum(x, axis=2, keepdims=True), axis=0, keepdims=True)  # (1,CB,1)
    mean = sum_c * inv_l
    diff = x - mean
    var = jnp.sum(jnp.sum(diff * diff, axis=2, keepdims=True),
                  axis=0, keepdims=True) * inv_l           # (1, CB, 1)

    inv_std = lax.rsqrt(var + eps)                         # EUP, not VALU divide
    gamma = gamma_ref[...].astype(jnp.float32)[None, :, :]  # (1, CB, 1)
    beta = beta_ref[...].astype(jnp.float32)[None, :, :]
    scale = gamma * inv_std
    shift = beta - mean * scale

    out_ref[...] = (x * scale + shift).astype(out_ref.dtype)
    mean_ref[...] = mean[0]                                # (CB, 1)
    var_ref[...] = var[0]


def bn_eval_kernel(x_ref, scale_ref, shift_ref, out_ref):
    """Inference-mode BN: pure streaming x*scale + shift (scale/shift folded in wrapper)."""
    x = x_ref[...].astype(jnp.float32)                     # (N, CB, HW)
    scale = scale_ref[...][None, :, :]                     # (1, CB, 1)
    shift = shift_ref[...][None, :, :]
    out_ref[...] = (x * scale + shift).astype(out_ref.dtype)


def _choose_channel_block(C, elems_per_channel, itemsize,
                          budget_bytes=16 * 1024 * 1024):
    """Largest channel block (== C, or a multiple of 8 dividing C) within a VMEM budget."""
    # Per-step cost per channel: double-buffered input + output blocks plus ~2 f32 temps.
    bytes_per_channel = elems_per_channel * (4 * itemsize + 8)
    max_cb = max(1, budget_bytes // max(1, bytes_per_channel))
    if C <= max_cb:
        return C
    cb = min(C - (C % 8), (max_cb // 8) * 8)
    while cb >= 8:
        if C % cb == 0:
            return cb
        cb -= 8
    # TODO(synk): when even a single channel's N*H*W slab exceeds VMEM, switch to a
    # two-pass kernel (grid-accumulated sum/sumsq with pl.when init/finalize, then a
    # streaming scale/shift pass) instead of over-sizing this single block.
    return C


def bn_layer_forward(x, gamma, beta, running_mean, running_var,
                     eps=1e-5, momentum=0.1, training=True):
    """Forward pass of BNLayer on NCHW input.

    gamma/beta/running_mean/running_var have shape (1, C, 1, 1) like the PyTorch
    module.  Returns (outputs, new_running_mean, new_running_var).
    """
    # TODO(synk): the 2-D (B, F) training branch of the PyTorch forward is not
    # implemented (its (1,C,1,1) gamma broadcast is degenerate for 2-D inputs);
    # only the NCHW feature-map path is supported.
    N, C, H, W = x.shape
    HW = H * W

    # Free relayout: merge contiguous H,W dims so the lane axis is H*W wide.
    x3 = x.reshape(N, C, HW)
    g = gamma.reshape(C, 1).astype(jnp.float32)
    b = beta.reshape(C, 1).astype(jnp.float32)

    cb = _choose_channel_block(C, N * HW, jnp.dtype(x.dtype).itemsize)
    grid = (C // cb,)
    x_spec = pl.BlockSpec((N, cb, HW), lambda c: (0, c, 0))
    vec_spec = pl.BlockSpec((cb, 1), lambda c: (c, 0))
    cparams = pltpu.CompilerParams(
        dimension_semantics=("parallel",),          # channel axis: megacore-shardable
        vmem_limit_bytes=40 * 1024 * 1024,
    )

    if training:
        out3, mean_c, var_c = pl.pallas_call(
            functools.partial(bn_train_kernel, eps=eps),
            out_shape=(
                jax.ShapeDtypeStruct((N, C, HW), x.dtype),
                jax.ShapeDtypeStruct((C, 1), jnp.float32),
                jax.ShapeDtypeStruct((C, 1), jnp.float32),
            ),
            grid=grid,
            in_specs=[x_spec, vec_spec, vec_spec],
            out_specs=(x_spec, vec_spec, vec_spec),
            compiler_params=cparams,
        )(x3, g, b)

        # Running-stats update on (C,1) vectors (no (1,C,1,1) intermediates).
        # Same (reversed-vs-torch) momentum convention and biased variance as the module.
        rm = running_mean.reshape(C, 1).astype(jnp.float32)
        rv = running_var.reshape(C, 1).astype(jnp.float32)
        new_rm = (momentum * rm + (1.0 - momentum) * mean_c) \
            .reshape(running_mean.shape).astype(running_mean.dtype)
        new_rv = (momentum * rv + (1.0 - momentum) * var_c) \
            .reshape(running_var.shape).astype(running_var.dtype)
    else:
        rm = running_mean.reshape(C, 1).astype(jnp.float32)
        rv = running_var.reshape(C, 1).astype(jnp.float32)
        scale = g * lax.rsqrt(rv + eps)            # tiny C-length prep in plain JAX
        shift = b - rm * scale
        out3 = pl.pallas_call(
            bn_eval_kernel,
            out_shape=jax.ShapeDtypeStruct((N, C, HW), x.dtype),
            grid=grid,
            in_specs=[x_spec, vec_spec, vec_spec],
            out_specs=x_spec,
            compiler_params=cparams,
        )(x3, scale, shift)
        new_rm, new_rv = running_mean, running_var

    return out3.reshape(N, C, H, W), new_rm, new_rv


def bn_train_reference(x, gamma, beta, eps):
    """Pure-JAX reference of the training-mode forward."""
    mean = jnp.mean(x, axis=(0, 2, 3), keepdims=True)
    var = jnp.mean((x - mean) ** 2, axis=(0, 2, 3), keepdims=True)
    return gamma * (x - mean) / jnp.sqrt(var + eps) + beta


if __name__ == "__main__":
    N, C, H, W = 2, 4, 16, 16
    eps, momentum = 1e-5, 0.1

    key = jax.random.PRNGKey(0)
    x = jax.random.normal(key, (N, C, H, W), dtype=jnp.float32)

    shape = (1, C, 1, 1)
    gamma = jnp.ones(shape, dtype=jnp.float32)
    beta = jnp.zeros(shape, dtype=jnp.float32)
    running_mean = jnp.zeros(shape, dtype=jnp.float32)
    running_var = jnp.ones(shape, dtype=jnp.float32)

    # --- training mode ---
    out, new_rm, new_rv = bn_layer_forward(
        x, gamma, beta, running_mean, running_var,
        eps=eps, momentum=momentum, training=True)
    jax.block_until_ready((out, new_rm, new_rv))

    ref = bn_train_reference(x, gamma, beta, eps)
    assert out.shape == (N, C, H, W)
    assert jnp.max(jnp.abs(out - ref)) < 1e-4

    # Running-stats update (module's convention: new = m*running + (1-m)*batch, biased var).
    batch_mean = jnp.mean(x, axis=(0, 2, 3), keepdims=True)
    batch_var = jnp.mean((x - batch_mean) ** 2, axis=(0, 2, 3), keepdims=True)
    assert jnp.max(jnp.abs(new_rm - (momentum * running_mean + (1 - momentum) * batch_mean))) < 1e-5
    assert jnp.max(jnp.abs(new_rv - (momentum * running_var + (1 - momentum) * batch_var))) < 1e-5

    # --- eval mode ---
    out_eval, _, _ = bn_layer_forward(
        x, gamma, beta, running_mean, running_var,
        eps=eps, momentum=momentum, training=False)
    jax.block_until_ready(out_eval)
    ref_eval = gamma * (x - running_mean) / jnp.sqrt(running_var + eps) + beta
    assert jnp.max(jnp.abs(out_eval - ref_eval)) < 1e-4

    print("KERNEL_OK")
</pallas_src>

<mosaic_0001>
module attributes {stable_mosaic.version = 11 : i64} {
  func.func @bn_train_kernel(%arg0: i32, %arg1: memref<2x4x256xf32, #tpu.memory_space<vmem>>, %arg2: memref<4x1xf32, #tpu.memory_space<vmem>>, %arg3: memref<4x1xf32, #tpu.memory_space<vmem>>, %arg4: memref<2x4x256xf32, #tpu.memory_space<vmem>>, %arg5: memref<4x1xf32, #tpu.memory_space<vmem>>, %arg6: memref<4x1xf32, #tpu.memory_space<vmem>>) attributes {dimension_semantics = [#tpu.dimension_semantics<parallel>], iteration_bounds = array<i64: 1>, scalar_prefetch = 0 : i64, scratch_operands = 0 : i64, tpu.core_type = #tpu.core_type<tc>, window_params = [{transform_indices = @transform_0, window_bounds = array<i64: 2, 4, 256>}, {transform_indices = @transform_1, window_bounds = array<i64: 4, 1>}, {transform_indices = @transform_2, window_bounds = array<i64: 4, 1>}, {transform_indices = @transform_3, window_bounds = array<i64: 2, 4, 256>}, {transform_indices = @transform_4, window_bounds = array<i64: 4, 1>}, {transform_indices = @transform_5, window_bounds = array<i64: 4, 1>}]} {
    %c0 = arith.constant 0 : index
    %c0_0 = arith.constant 0 : index
    %c0_1 = arith.constant 0 : index
    %0 = vector.load %arg1[%c0, %c0_0, %c0_1] : memref<2x4x256xf32, #tpu.memory_space<vmem>>, vector<2x4x256xf32>
    %cst = arith.constant dense<0.000000e+00> : vector<2x4xf32>
    %1 = vector.multi_reduction <add>, %0, %cst [2] : vector<2x4x256xf32> to vector<2x4xf32>
    %2 = vector.shape_cast %1 : vector<2x4xf32> to vector<2x4x1xf32>
    %cst_2 = arith.constant dense<0.000000e+00> : vector<4x1xf32>
    %3 = vector.multi_reduction <add>, %2, %cst_2 [0] : vector<2x4x1xf32> to vector<4x1xf32>
    %4 = vector.shape_cast %3 : vector<4x1xf32> to vector<1x4x1xf32>
    %cst_3 = arith.constant 0.001953125 : f32
    %5 = vector.broadcast %cst_3 : f32 to vector<1x4x1xf32>
    %6 = arith.mulf %4, %5 : vector<1x4x1xf32>
    %7 = vector.broadcast %6 : vector<1x4x1xf32> to vector<2x4x256xf32>
    %8 = arith.subf %0, %7 : vector<2x4x256xf32>
    %9 = arith.mulf %8, %8 : vector<2x4x256xf32>
    %cst_4 = arith.constant dense<0.000000e+00> : vector<2x4xf32>
    %10 = vector.multi_reduction <add>, %9, %cst_4 [2] : vector<2x4x256xf32> to vector<2x4xf32>
    %11 = vector.shape_cast %10 : vector<2x4xf32> to vector<2x4x1xf32>
    %cst_5 = arith.constant dense<0.000000e+00> : vector<4x1xf32>
    %12 = vector.multi_reduction <add>, %11, %cst_5 [0] : vector<2x4x1xf32> to vector<4x1xf32>
    %13 = vector.shape_cast %12 : vector<4x1xf32> to vector<1x4x1xf32>
    %cst_6 = arith.constant 0.001953125 : f32
    %14 = vector.broadcast %cst_6 : f32 to vector<1x4x1xf32>
    %15 = arith.mulf %13, %14 : vector<1x4x1xf32>
    %cst_7 = arith.constant 9.99999974E-6 : f32
    %16 = vector.broadcast %cst_7 : f32 to vector<1x4x1xf32>
    %17 = arith.addf %15, %16 : vector<1x4x1xf32>
    %18 = math.rsqrt %17 : vector<1x4x1xf32>
    %c0_8 = arith.constant 0 : index
    %c0_9 = arith.constant 0 : index
    %19 = vector.load %arg2[%c0_8, %c0_9] : memref<4x1xf32, #tpu.memory_space<vmem>>, vector<4x1xf32>
    %20 = vector.shape_cast %19 : vector<4x1xf32> to vector<1x4x1xf32>
    %c0_10 = arith.constant 0 : index
    %c0_11 = arith.constant 0 : index
    %21 = vector.load %arg3[%c0_10, %c0_11] : memref<4x1xf32, #tpu.memory_space<vmem>>, vector<4x1xf32>
    %22 = vector.shape_cast %21 : vector<4x1xf32> to vector<1x4x1xf32>
    %23 = arith.mulf %20, %18 : vector<1x4x1xf32>
    %24 = arith.mulf %6, %23 : vector<1x4x1xf32>
    %25 = arith.subf %22, %24 : vector<1x4x1xf32>
    %26 = vector.broadcast %23 : vector<1x4x1xf32> to vector<2x4x256xf32>
    %27 = arith.mulf %0, %26 : vector<2x4x256xf32>
    %28 = vector.broadcast %25 : vector<1x4x1xf32> to vector<2x4x256xf32>
    %29 = arith.addf %27, %28 : vector<2x4x256xf32>
    %c0_12 = arith.constant 0 : index
    %c0_13 = arith.constant 0 : index
    %c0_14 = arith.constant 0 : index
    %30 = vector.load %arg4[%c0_12, %c0_13, %c0_14] : memref<2x4x256xf32, #tpu.memory_space<vmem>>, vector<2x4x256xf32>
    tpu.vector_store %arg4[%c0_12, %c0_13, %c0_14], %29 {strides = array<i32>} : memref<2x4x256xf32, #tpu.memory_space<vmem>>, vector<2x4x256xf32>,
    %31 = vector.shape_cast %6 : vector<1x4x1xf32> to vector<4x1xf32>
    %c0_15 = arith.constant 0 : index
    %c0_16 = arith.constant 0 : index
    %32 = vector.load %arg5[%c0_15, %c0_16] : memref<4x1xf32, #tpu.memory_space<vmem>>, vector<4x1xf32>
    tpu.vector_store %arg5[%c0_15, %c0_16], %31 {strides = array<i32>} : memref<4x1xf32, #tpu.memory_space<vmem>>, vector<4x1xf32>,
    %33 = vector.shape_cast %15 : vector<1x4x1xf32> to vector<4x1xf32>
    %c0_17 = arith.constant 0 : index
    %c0_18 = arith.constant 0 : index
    %34 = vector.load %arg6[%c0_17, %c0_18] : memref<4x1xf32, #tpu.memory_space<vmem>>, vector<4x1xf32>
    tpu.vector_store %arg6[%c0_17, %c0_18], %33 {strides = array<i32>} : memref<4x1xf32, #tpu.memory_space<vmem>>, vector<4x1xf32>,
    return
  }
  func.func @transform_0(%arg0: i32) -> (i32, i32, i32) {
    %c0_i32 = arith.constant 0 : i32
    %c0_i32_0 = arith.constant 0 : i32
    %c0_i32_1 = arith.constant 0 : i32
    return %c0_i32, %arg0, %c0_i32_0 : i32, i32, i32
  }
  func.func @transform_1(%arg0: i32) -> (i32, i32) {
    %c0_i32 = arith.constant 0 : i32
    %c0_i32_0 = arith.constant 0 : i32
    return %arg0, %c0_i32 : i32, i32
  }
  func.func @transform_2(%arg0: i32) -> (i32, i32) {
    %c0_i32 = arith.constant 0 : i32
    %c0_i32_0 = arith.constant 0 : i32
    return %arg0, %c0_i32 : i32, i32
  }
  func.func @transform_3(%arg0: i32) -> (i32, i32, i32) {
    %c0_i32 = arith.constant 0 : i32
    %c0_i32_0 = arith.constant 0 : i32
    %c0_i32_1 = arith.constant 0 : i32
    return %c0_i32, %arg0, %c0_i32_0 : i32, i32, i32
  }
  func.func @transform_4(%arg0: i32) -> (i32, i32) {
    %c0_i32 = arith.constant 0 : i32
    %c0_i32_0 = arith.constant 0 : i32
    return %arg0, %c0_i32 : i32, i32
  }
  func.func @transform_5(%arg0: i32) -> (i32, i32) {
    %c0_i32 = arith.constant 0 : i32
    %c0_i32_0 = arith.constant 0 : i32
    return %arg0, %c0_i32 : i32, i32
  }
}

</mosaic_0001>

<bundles_post_ra>
// kernel: tpu_custom_call.1
= control target key start
LH: loop header
LB: loop body
LE: loop exit
PB: predicated region body
PF: predicated region fallthrough
CT: control target
= control target key end

     0   :  { %11 = vsyncpa [#allocation3], 0  ;;  %s317_s0 = inlined_call_operand.hbm [shape: f32[2,4,256], index: 0, kind: input, shape index: {}]   ;;  %s318_s1 = inlined_call_operand.vmem [shape: f32[4,1], index: 1, kind: input, shape index: {}]   ;;  %s319_s2 = inlined_call_operand.vmem [shape: f32[4,1], index: 2, kind: input, shape index: {}]   ;;  %s320_s3 = inlined_call_operand.hbm [shape: f32[2,4,256], index: 3, kind: output, shape index: {0}]   ;;  %s321_s4 = inlined_call_operand.vmem [shape: f32[4,1], index: 4, kind: output, shape index: {1}]   ;;  %s322_s5 = inlined_call_operand.vmem [shape: f32[4,1], index: 5, kind: output, shape index: {2}]  }
   0x1   :  { %12 = vsyncpa [#allocation4], 0  ;;  %s17_s20 = sshll.u32 %s317_s0, 4  ;;  %s233_s21 = smov [#allocation2]   ;;  %s18_s20 = int_to_ptr.hbm [resolvable:$true] %s17_s20 }
   0x2   :  { %s19_s22 = sshll.u32 %s233_s21, 4  ;;  %s234_s23 = smov 128   ;;  %s20_s22 = int_to_ptr.vmem [resolvable:$true] %s19_s22 }
   0x3   :  { %s235_s24 = smov 8  }
   0x4   :  { %25 = dma.hbm_to_vmem [thread:$0]  %s18_s20, 256, %s20_s22, [#allocation3], %s234_s23, %s234_s23, %s235_s24  }
   0x5   :  { %229 = dma.done.wait [#allocation3], 256  }
   0x6   :  { %230 = vsyncadd [#allocation3], 4294967040  ;;  %v275_v0 = vld [vmem:[#allocation2] sm:$0xff]  ;;  %v277_v1 = vld [vmem:[#allocation2 + $0x8] sm:$0xff]  ;;  %vm49_vm0 = vcmask 1043456   ;;  %vm141_vm1 = vcmask 3072  }
   0x7   :  { %38 = vst [vmem:[#allocation1] ss:$2 sm:$0xff] %v275_v0  ;;  %v236_v13 = vmov 839922192   ;;  %v237_v36 = vmov 0   ;;  %s150_s8 = sshll.u32 %s320_s3, 4  ;;  %s151_s8 = int_to_ptr.hbm [resolvable:$true] %s150_s8 }
   0x8   :  { %42 = vst [vmem:[#allocation1 + $0x10] ss:$2 sm:$0xff] %v277_v1  ;;  %v66_v14 = vunpack.c.l.s4 %v236_v13  ;;  %177 = vset.pattern.permute.xlu2 %v237_v36  ;;  %178 = vset.pattern.permute.xlu0 %v237_v36  ;;  %v112_v50 = vld [vmem:[%s318_s1] sm:$0xf]  ;;  %s238_s1 = smov [#allocation5]  }
   0x9   :  { %v113_v54 = vld [vmem:[%s319_s2] sm:$0xf]  ;;  %s148_s30 = sshll.u32 %s238_s1, 4  ;;  %s149_s30 = int_to_ptr.vmem [resolvable:$true] %s148_s30 }
   0xa   :  { %v67_v18 = vunpack.c.0.s8 %v66_v14 }
   0xe   :  { %v39_v2 = vld.sshfl [vmem:[#allocation1] sm:$0xff pattern:$0x75316420]  ;;  %v40_v3 = vld.sshfl [vmem:[#allocation1 + $0x8] sm:$0xff pattern:$0x75316420] }
   0xf   :  { %v50_v4 = vsel %vm49_vm0, %v39_v2, 0.0  ;;  %v51_v5 = vsel %vm49_vm0, %v40_v3, 0.0  ;;  %v43_v7 = vld.sshfl [vmem:[#allocation1 + $0x10] sm:$0xff pattern:$0x75316420] }
  0x10   :  { %v52_v6 = vadd.f32 %v51_v5, %v50_v4  ;;  %v44_v8 = vld.sshfl [vmem:[#allocation1 + $0x18] sm:$0xff pattern:$0x75316420]  ;;  %v55_v9 = vsel %vm49_vm0, %v43_v7, 0.0 }
  0x11   :  { %v56_v10 = vsel %vm49_vm0, %v44_v8, 0.0 }
  0x12   :  { %53 = vadd.xlane.f32.xlu0 %v52_v6  ;;  %v57_v11 = vadd.f32 %v56_v10, %v55_v9 }
  0x1a   :  { %58 = vadd.xlane.f32.xlu0 %v57_v11 }
  0x85   :  { %v54_v12 = vpop.xlane.xlu0 %53 }
  0x86   :  { %v60_v16 = vsel %vm49_vm0, %v54_v12, 0.0 }
  0x8d   :  { %v59_v15 = vpop.xlane.xlu0 %58 }
  0x8e   :  { %v61_v17 = vsel %vm49_vm0, %v59_v15, 0.0 }
  0x8f   :  { %v62_v19 = vadd.f32 %v61_v17, %v60_v16 }
  0x91   :  { %v63_v20 = vmul.f32 0.001953125, %v62_v19 }
  0x93   :  { %v68_v21 = vperm.slane %v63_v20, %v67_v18  ;;  %142 = vst.msk [vmem:[%s321_s4] sm:$0xf] %vm141_vm1, %v63_v20 }
  0x95   :  { %v70_v22 = vsub.f32 %v275_v0, %v68_v21  ;;  %v71_v23 = vsub.f32 %v277_v1, %v68_v21 }
  0x97   :  { %v72_v24 = vmul.f32 %v70_v22, %v70_v22  ;;  %v73_v25 = vmul.f32 %v71_v23, %v71_v23 }
  0x99   :  { %76 = vst [vmem:[#allocation1] ss:$2 sm:$0xff] %v72_v24 }
  0x9a   :  { %80 = vst [vmem:[#allocation1 + $0x10] ss:$2 sm:$0xff] %v73_v25 }
  0xa0   :  { %v77_v26 = vld.sshfl [vmem:[#allocation1] sm:$0xff pattern:$0x75316420]  ;;  %v78_v27 = vld.sshfl [vmem:[#allocation1 + $0x8] sm:$0xff pattern:$0x75316420] }
  0xa1   :  { %v87_v28 = vsel %vm49_vm0, %v77_v26, 0.0  ;;  %v88_v29 = vsel %vm49_vm0, %v78_v27, 0.0  ;;  %v81_v31 = vld.sshfl [vmem:[#allocation1 + $0x10] sm:$0xff pattern:$0x75316420] }
  0xa2   :  { %v89_v30 = vadd.f32 %v88_v29, %v87_v28  ;;  %v82_v32 = vld.sshfl [vmem:[#allocation1 + $0x18] sm:$0xff pattern:$0x75316420]  ;;  %v92_v33 = vsel %vm49_vm0, %v81_v31, 0.0 }
  0xa3   :  { %v93_v34 = vsel %vm49_vm0, %v82_v32, 0.0 }
  0xa4   :  { %90 = vadd.xlane.f32.xlu1 %v89_v30  ;;  %v94_v35 = vadd.f32 %v93_v34, %v92_v33 }
  0xac   :  { %95 = vadd.xlane.f32.xlu1 %v94_v35 }
 0x117   :  { %v91_v37 = vpop.xlane.xlu1 %90 }
 0x118   :  { %v97_v39 = vsel %vm49_vm0, %v91_v37, 0.0 }
 0x11f   :  { %v96_v38 = vpop.xlane.xlu1 %95 }
 0x120   :  { %v98_v40 = vsel %vm49_vm0, %v96_v38, 0.0 }
 0x121   :  { %v99_v41 = vadd.f32 %v98_v40, %v97_v39 }
 0x123   :  { %v100_v42 = vmul.f32 0.001953125, %v99_v41 }
 0x125   :  { %v101_v43 = vadd.f32 1e-05, %v100_v42  ;;  %143 = vst.msk [vmem:[%s322_s5] sm:$0xf] %vm141_vm1, %v100_v42 }
 0x127   :  { %179 = vrsqrt.f32 %v101_v43  ;;  %vm108_vm3 = vweird.f32 %v101_v43 }
 0x12d   :  { %v180_v44 = vpop.eup %179 }
 0x12e   :  { %v103_v45 = vmul.f32 %v180_v44, %v101_v43  ;;  %vm109_vm2 = vweird.f32 %v180_v44 }
 0x12f   :  { %vm110_vm4 = vmor %vm108_vm3, %vm109_vm2 }
 0x130   :  { %v104_v46 = vmul.f32 %v180_v44, %v103_v45 }
 0x132   :  { %v105_v47 = vmul.f32 0.5, %v104_v46 }
 0x134   :  { %v106_v48 = vsub.f32 1.5, %v105_v47 }
 0x136   :  { %v107_v49 = vmul.f32 %v180_v44, %v106_v48 }
 0x138   :  { %v111_v51 = vsel %vm110_vm4, %v180_v44, %v107_v49 }
 0x139   :  { %v114_v52 = vmul.f32 %v112_v50, %v111_v51 }
 0x13b   :  { %119 = vperm.xlu2 %177, %v114_v52   ;;  %v115_v53 = vmul.f32 %v114_v52, %v63_v20 }
 0x13d   :  { %v116_v55 = vsub.f32 %v113_v54, %v115_v53 }
 0x143   :  { %130 = vperm.xlu2 %177, %v116_v55  }
 0x195   :  { %v120_v56 = vpop.permute.xlu2 %119 }
 0x196   :  { %v124_v57 = vperm.slane %v120_v56, %v67_v18 }
 0x198   :  { %v126_v59 = vmul.f32 %v124_v57, %v275_v0  ;;  %v127_v60 = vmul.f32 %v124_v57, %v277_v1 }
 0x19d   :  { %v131_v58 = vpop.permute.xlu2 %130 }
 0x19e   :  { %v135_v61 = vperm.slane %v131_v58, %v67_v18 }
 0x1a0   :  { %v137_v62 = vadd.f32 %v135_v61, %v126_v59  ;;  %v138_v63 = vadd.f32 %v135_v61, %v127_v60 }
 0x1a2   :  { %139 = vst [vmem:[#allocation5] sm:$0xff] %v137_v62 }
 0x1a3   :  { %140 = vst [vmem:[#allocation5 + $0x8] sm:$0xff] %v138_v63 }
 0x1a4   :  { %156 = dma.vmem_to_hbm [thread:$0]  %s149_s30, 256, %s151_s8, [#allocation4], %s234_s23, %s234_s23, %s235_s24  }
 0x1a5   :  { %231 = dma.done.wait [#allocation4], 256  }
 0x1a6   :  { %232 = vsyncadd [#allocation4], 4294967040 }
 0x1a7   :  { %169 = vsyncpa [#allocation3], 1 }
 0x1a8   :  { %170 = vsyncpa [#allocation4], 1 }

</bundles_post_ra>
